<compile_context>
chip_gen: v7x
topology: tpu7x:2x2x1
jax: 0.10.0
libtpu: 0.0.40
codegen_flags: <defaults>
</compile_context>

<pallas_src>
import math
from functools import partial

import jax
import jax.numpy as jnp
from jax.experimental import pallas as pl
from jax.experimental.pallas import tpu as pltpu


# ----------------------------- kernels -------------------------------------

def _scores_bias_kernel(tw_ref, src_ref, sbias_ref, tbias_ref, out_ref):
    # tw_ref:  (bb, tT, Es) bf16     src_ref: (bb, tS, Es) bf16
    # sbias:   (bb, 1, tS)  f32      tbias:   (bb, tT, 1)  f32   (0 / -inf)
    # out_ref: (bb, tT, tS) f32
    scores = jax.lax.dot_general(
        tw_ref[...], src_ref[...],
        dimension_numbers=(((2,), (2,)), ((0,), (0,))),
        preferred_element_type=jnp.float32)                 # (bb, tT, tS)
    out_ref[...] = scores + sbias_ref[...] + tbias_ref[...]


def _scores_nomask_kernel(tw_ref, src_ref, out_ref):
    out_ref[...] = jax.lax.dot_general(
        tw_ref[...], src_ref[...],
        dimension_numbers=(((2,), (2,)), ((0,), (0,))),
        preferred_element_type=jnp.float32)


# --------------------------- pallas wrapper ---------------------------------

@partial(jax.jit, static_argnames=("bb", "tT", "tS", "s_outer", "has_mask"))
def _attention_pallas(tw_bf16, src_bf16, sbias, tbias, *,
                      bb, tT, tS, s_outer, has_mask):
    B, T, Es = tw_bf16.shape
    _, S, _ = src_bf16.shape

    nb = pl.cdiv(B, bb)
    nt = pl.cdiv(T, tT)
    ns = pl.cdiv(S, tS)

    if s_outer:
        # source (the larger operand when S >= T) is block-invariant over the
        # innermost axis -> fetched once; tw is re-streamed ns times.
        grid = (nb, ns, nt)
        tw_map  = lambda b, j, i: (b, i, 0)
        src_map = lambda b, j, i: (b, j, 0)
        sb_map  = lambda b, j, i: (b, 0, j)
        tb_map  = lambda b, j, i: (b, i, 0)
        out_map = lambda b, j, i: (b, i, j)
        tw_reads, src_reads = ns, 1
    else:
        grid = (nb, nt, ns)
        tw_map  = lambda b, i, j: (b, i, 0)
        src_map = lambda b, i, j: (b, j, 0)
        sb_map  = lambda b, i, j: (b, 0, j)
        tb_map  = lambda b, i, j: (b, i, 0)
        out_map = lambda b, i, j: (b, i, j)
        tw_reads, src_reads = 1, nt

    in_specs = [
        pl.BlockSpec((bb, tT, Es), tw_map),    # target @ W   (bf16)
        pl.BlockSpec((bb, tS, Es), src_map),   # source       (bf16)
    ]
    args = [tw_bf16, src_bf16]
    if has_mask:
        in_specs += [
            pl.BlockSpec((bb, 1, tS), sb_map),   # source bias (f32, 0/-inf)
            pl.BlockSpec((bb, tT, 1), tb_map),   # target bias (f32, 0/-inf)
        ]
        args += [sbias, tbias]
        kernel = _scores_bias_kernel
        mask_bytes = sbias.size * 4 + tbias.size * 4
    else:
        kernel = _scores_nomask_kernel
        mask_bytes = 0

    flops = 2 * B * T * Es * S
    bytes_accessed = (tw_bf16.size * 2 * tw_reads
                      + src_bf16.size * 2 * src_reads
                      + mask_bytes
                      + B * T * S * 4)

    return pl.pallas_call(
        kernel,
        out_shape=jax.ShapeDtypeStruct((B, T, S), jnp.float32),
        grid=grid,
        in_specs=in_specs,
        out_specs=pl.BlockSpec((bb, tT, tS), out_map),
        compiler_params=pltpu.CompilerParams(
            dimension_semantics=("parallel", "parallel", "parallel"),
            vmem_limit_bytes=48 * 1024 * 1024),
        cost_estimate=pl.CostEstimate(flops=flops, transcendentals=0,
                                      bytes_accessed=bytes_accessed),
    )(*args)


# ------------------------- tile / grid heuristic ----------------------------

def _choose_tiles(B, T, S_pad, Es):
    """S_pad is a multiple of 128.  Returns (bb, tT, tS, s_outer)."""
    cdiv = lambda a, b: -(-a // b)

    # Target tile: full T when small, else a 512-row (MXU-friendly) tile.
    tT = T if T <= 512 else 512
    # Source tile: lane-dense (multiple of 128), capped at 2048.
    tS = S_pad if S_pad <= 2048 else 2048

    # Small-(T,S) problems: batch several examples per step to fill bf16
    # sublanes (16 rows / vreg) and amortize the ~0.35us per-step overhead.
    bb = min(B, 16) if (T * S_pad <= 128 * 128) else 1

    # VMEM budget: keep the double-buffered working set under ~36 MiB so the
    # pipeline stays double-buffered even on v7x's 64 MiB VMEM.
    budget = 36 * 1024 * 1024

    def footprint(bb_, tT_, tS_):
        per_step = bb_ * (tT_ * Es * 2          # tw tile   (bf16)
                          + tS_ * Es * 2        # src tile  (bf16)
                          + tT_ * tS_ * 4       # out tile  (f32)
                          + tS_ * 4 + tT_ * 4)  # bias tiles (f32)
        return 2 * per_step                     # double buffering

    while footprint(bb, tT, tS) > budget and tS > 256:
        tS = max(128, (tS // 2) // 128 * 128)
    while footprint(bb, tT, tS) > budget and tT > 64:
        tT = max(8, (tT // 2) // 8 * 8)
    while footprint(bb, tT, tS) > budget and bb > 1:
        bb = max(1, bb // 2)

    # v7x has 2 TensorCores: guarantee >=2 grid programs when possible so a
    # single-block problem does not leave one core idle.
    n_prog = cdiv(B, bb) * cdiv(T, tT) * cdiv(S_pad, tS)
    if n_prog < 2:
        if B >= 2:
            bb = max(1, B // 2)
        elif S_pad >= 256:
            tS = max(128, (S_pad // 2) // 128 * 128)
        elif T >= 16:
            tT = max(8, (T // 2) // 8 * 8)

    # Grid order: keep the larger operand resident over the innermost axis.
    s_outer = S_pad >= T
    return bb, tT, tS, s_outer


# ------------------------------ public API ----------------------------------

def general_attention(source_vectors, target_vectors, W,
                      source_mask=None, target_mask=None):
    """Mirrors GeneralAttention.forward semantics."""
    target_is_single_vector = target_vectors.ndim == 2
    if target_is_single_vector:
        if target_mask is not None:
            raise ValueError("target_mask is not valid when target is a single vector")
        target_vectors = target_vectors[:, None, :]

    B, T, _Et = target_vectors.shape
    _, S, Es = source_vectors.shape

    # Hoisted first matmul: computed once in XLA, bf16 operands, f32 accum.
    # (Double bf16 rounding vs a full-f32 pipeline; acceptable for attention
    # scores and covered by the test tolerance.)
    tw = jnp.einsum("bte,ef->btf",
                    target_vectors.astype(jnp.bfloat16),
                    W.astype(jnp.bfloat16),
                    preferred_element_type=jnp.float32).astype(jnp.bfloat16)
    src = source_vectors.astype(jnp.bfloat16)

    # Pad S to a multiple of 128 -> lane-dense output blocks (unmasked vst).
    S_pad = -(-S // 128) * 128
    if S_pad != S:
        src = jnp.pad(src, ((0, 0), (0, S_pad - S), (0, 0)))

    # Masks as additive f32 biases (0 keep / -inf drop); mask-free kernel when
    # neither mask is provided.
    has_mask = (source_mask is not None) or (target_mask is not None)
    sbias = tbias = None
    if has_mask:
        neg_inf = jnp.float32(-jnp.inf)
        if source_mask is not None:
            sm = jnp.asarray(source_mask).astype(bool)
            sb = jnp.where(sm, jnp.float32(0.0), neg_inf).astype(jnp.float32)
        else:
            sb = jnp.zeros((B, S), jnp.float32)
        if S_pad != S:
            sb = jnp.pad(sb, ((0, 0), (0, S_pad - S)))   # padded cols sliced off
        sbias = sb.reshape(B, 1, S_pad)
        if target_mask is not None:
            tm = jnp.asarray(target_mask).astype(bool)
            tbias = jnp.where(tm, jnp.float32(0.0), neg_inf).astype(jnp.float32)
            tbias = tbias.reshape(B, T, 1)
        else:
            tbias = jnp.zeros((B, T, 1), jnp.float32)

    bb, tT, tS, s_outer = _choose_tiles(B, T, S_pad, Es)

    out = _attention_pallas(tw, src, sbias, tbias,
                            bb=bb, tT=tT, tS=tS,
                            s_outer=s_outer, has_mask=has_mask)

    if S_pad != S:
        out = out[:, :, :S]
    if target_is_single_vector:
        out = out[:, 0, :]
    return out


# ------------------------------ test harness --------------------------------

def xavier_uniform(key, shape, dtype=jnp.float32):
    fan_in, fan_out = shape[1], shape[0]
    limit = math.sqrt(6.0 / (fan_in + fan_out))
    return jax.random.uniform(key, shape, dtype, minval=-limit, maxval=limit)


def _reference(source_vectors, target_vectors, W, source_mask, target_mask):
    scores = jnp.einsum("bte,ef,bsf->bts", target_vectors, W, source_vectors)
    if source_mask is not None:
        scores = jnp.where(source_mask[:, None, :], scores, -jnp.inf)
    if target_mask is not None:
        scores = jnp.where(target_mask[:, :, None], scores, -jnp.inf)
    return scores


def _check(out, ref):
    finite = jnp.isfinite(ref)
    assert bool(jnp.all(jnp.isfinite(out) == finite))
    assert bool(jnp.allclose(jnp.where(finite, out, 0.0),
                             jnp.where(finite, ref, 0.0),
                             atol=1e-1, rtol=5e-2))


if __name__ == "__main__":
    key = jax.random.PRNGKey(0)
    k_w, k_src, k_tgt, k_sm, k_tm = jax.random.split(key, 5)

    B, T, S = 2, 8, 16
    Et, Es = 32, 32

    W = xavier_uniform(k_w, (Et, Es))                      # (target_emb, source_emb)
    source_vectors = jax.random.normal(k_src, (B, S, Es), jnp.float32)
    target_vectors = jax.random.normal(k_tgt, (B, T, Et), jnp.float32)
    source_mask = jax.random.bernoulli(k_sm, 0.8, (B, S))
    target_mask = jax.random.bernoulli(k_tm, 0.8, (B, T))

    # Masked path.
    out = general_attention(source_vectors, target_vectors, W,
                            source_mask, target_mask)
    out = jax.block_until_ready(out)
    assert out.shape == (B, T, S)
    _check(out, _reference(source_vectors, target_vectors, W,
                           source_mask, target_mask))

    # Mask-free specialized kernel path.
    out_nm = general_attention(source_vectors, target_vectors, W)
    out_nm = jax.block_until_ready(out_nm)
    assert out_nm.shape == (B, T, S)
    _check(out_nm, _reference(source_vectors, target_vectors, W, None, None))

    # Single-target-vector path (no target_mask allowed).
    single = general_attention(source_vectors, target_vectors[:, 0, :], W,
                               source_mask, None)
    single = jax.block_until_ready(single)
    assert single.shape == (B, S)
    ref_single = _reference(source_vectors, target_vectors[:, :1, :], W,
                            source_mask, None)[:, 0, :]
    _check(single, ref_single)

    print("KERNEL_OK")
</pallas_src>

<mosaic_0001>
module attributes {stable_mosaic.version = 11 : i64} {
  func.func @_scores_bias_kernel(%arg0: i32, %arg1: i32, %arg2: i32, %arg3: memref<1x8x32xbf16, #tpu.memory_space<vmem>>, %arg4: memref<1x128x32xbf16, #tpu.memory_space<vmem>>, %arg5: memref<1x1x128xf32, #tpu.memory_space<vmem>>, %arg6: memref<1x8x1xf32, #tpu.memory_space<vmem>>, %arg7: memref<1x8x128xf32, #tpu.memory_space<vmem>>) attributes {dimension_semantics = [#tpu.dimension_semantics<parallel>, #tpu.dimension_semantics<parallel>, #tpu.dimension_semantics<parallel>], iteration_bounds = array<i64: 2, 1, 1>, scalar_prefetch = 0 : i64, scratch_operands = 0 : i64, tpu.core_type = #tpu.core_type<tc>, window_params = [{transform_indices = @transform_0, window_bounds = array<i64: 1, 8, 32>}, {transform_indices = @transform_1, window_bounds = array<i64: 1, 128, 32>}, {transform_indices = @transform_2, window_bounds = array<i64: 1, 1, 128>}, {transform_indices = @transform_3, window_bounds = array<i64: 1, 8, 1>}, {transform_indices = @transform_4, window_bounds = array<i64: 1, 8, 128>}]} {
    %c0 = arith.constant 0 : index
    %c0_0 = arith.constant 0 : index
    %c0_1 = arith.constant 0 : index
    %0 = vector.load %arg3[%c0, %c0_0, %c0_1] : memref<1x8x32xbf16, #tpu.memory_space<vmem>>, vector<1x8x32xbf16>
    %c0_2 = arith.constant 0 : index
    %c0_3 = arith.constant 0 : index
    %c0_4 = arith.constant 0 : index
    %1 = vector.load %arg4[%c0_2, %c0_3, %c0_4] : memref<1x128x32xbf16, #tpu.memory_space<vmem>>, vector<1x128x32xbf16>
    %cst = arith.constant dense<0.000000e+00> : vector<1x8x128xf32>
    %2 = tpu.matmul %0, %1, %cst {dimension_numbers = #tpu.dot_dimension_numbers<[2], [2], [1], [1], [0, 0, 0, 1, 1, 1], [0], [0]>} : vector<1x8x32xbf16>, vector<1x128x32xbf16>, vector<1x8x128xf32> -> vector<1x8x128xf32>
    %c0_5 = arith.constant 0 : index
    %c0_6 = arith.constant 0 : index
    %c0_7 = arith.constant 0 : index
    %3 = vector.load %arg5[%c0_5, %c0_6, %c0_7] : memref<1x1x128xf32, #tpu.memory_space<vmem>>, vector<1x1x128xf32>
    %4 = vector.broadcast %3 : vector<1x1x128xf32> to vector<1x8x128xf32>
    %5 = arith.addf %2, %4 : vector<1x8x128xf32>
    %c0_8 = arith.constant 0 : index
    %c0_9 = arith.constant 0 : index
    %c0_10 = arith.constant 0 : index
    %6 = vector.load %arg6[%c0_8, %c0_9, %c0_10] : memref<1x8x1xf32, #tpu.memory_space<vmem>>, vector<1x8x1xf32>
    %7 = vector.broadcast %6 : vector<1x8x1xf32> to vector<1x8x128xf32>
    %8 = arith.addf %5, %7 : vector<1x8x128xf32>
    %c0_11 = arith.constant 0 : index
    %c0_12 = arith.constant 0 : index
    %c0_13 = arith.constant 0 : index
    %9 = vector.load %arg7[%c0_11, %c0_12, %c0_13] : memref<1x8x128xf32, #tpu.memory_space<vmem>>, vector<1x8x128xf32>
    tpu.vector_store %arg7[%c0_11, %c0_12, %c0_13], %8 {strides = array<i32>} : memref<1x8x128xf32, #tpu.memory_space<vmem>>, vector<1x8x128xf32>,
    return
  }
  func.func @transform_0(%arg0: i32, %arg1: i32, %arg2: i32) -> (i32, i32, i32) {
    %c0_i32 = arith.constant 0 : i32
    %c0_i32_0 = arith.constant 0 : i32
    return %arg0, %arg2, %c0_i32 : i32, i32, i32
  }
  func.func @transform_1(%arg0: i32, %arg1: i32, %arg2: i32) -> (i32, i32, i32) {
    %c0_i32 = arith.constant 0 : i32
    %c0_i32_0 = arith.constant 0 : i32
    return %arg0, %arg1, %c0_i32 : i32, i32, i32
  }
  func.func @transform_2(%arg0: i32, %arg1: i32, %arg2: i32) -> (i32, i32, i32) {
    %c0_i32 = arith.constant 0 : i32
    %c0_i32_0 = arith.constant 0 : i32
    return %arg0, %c0_i32, %arg1 : i32, i32, i32
  }
  func.func @transform_3(%arg0: i32, %arg1: i32, %arg2: i32) -> (i32, i32, i32) {
    %c0_i32 = arith.constant 0 : i32
    %c0_i32_0 = arith.constant 0 : i32
    return %arg0, %arg2, %c0_i32 : i32, i32, i32
  }
  func.func @transform_4(%arg0: i32, %arg1: i32, %arg2: i32) -> (i32, i32, i32) {
    %c0_i32 = arith.constant 0 : i32
    return %arg0, %arg2, %arg1 : i32, i32, i32
  }
}

</mosaic_0001>

<bundles_post_ra>
// kernel: _attention_pallas.1
= control target key start
LH: loop header
LB: loop body
LE: loop exit
PB: predicated region body
PF: predicated region fallthrough
CT: control target
= control target key end

     0   :  { %9 = vsyncpa [#allocation3], 0  ;;  %s969_s0 = inlined_call_operand.vmem [shape: bf16[2,8,32], index: 0, kind: input, shape index: {}]   ;;  %s970_s1 = inlined_call_operand.vmem [shape: bf16[2,128,32], index: 1, kind: input, shape index: {}]   ;;  %s971_s2 = inlined_call_operand.vmem [shape: f32[2,1,128], index: 2, kind: input, shape index: {}]   ;;  %s972_s3 = inlined_call_operand.vmem [shape: f32[2,8,1], index: 3, kind: input, shape index: {}]   ;;  %s973_s4 = inlined_call_operand.hbm [shape: f32[2,8,128], index: 4, kind: output, shape index: {}]  }
   0x1   :  { %11 = vsyncpa [#allocation3 + $0x1], 0  ;;  %s823_s15 = smov 0   ;;  %s825_s16 = smov 0  }
   0x2   :  { %s827_s17 = smov 0   ;;  %s829_s18 = smov 0  }
   0x3   :  { %s831_s19 = smov 0   ;;  %s833_s20 = smov 0  }
   0x4 LB: > { %s593_s21 = sadd.s32 4294967295, %s792_s20   ;;  %s594_s22 = sadd.s32 4294967294, %s792_s20   ;;  %s792_s20 = sphi %s833_s20, %s17_s20   ;;  %s788_s19 = sphi %s831_s19, %s980_s19   ;;  %s784_s18 = sphi %s829_s18, %s979_s18   ;;  %s780_s17 = sphi %s827_s17, %s978_s17   ;;  %s776_s16 = sphi %s825_s16, %s977_s16   ;;  %s772_s15 = sphi %s823_s15, %s976_s15  }
   0x5   : > { %s36_s23 = sadd.s32 1, %s788_s19  ;;  %s159_s24 = sadd.s32 1, %s780_s17 }
   0x6   : > { %p38_p0 = scmp.ge.s32.totalorder %s36_s23, 2  ;;  %p169_p1 = scmp.ne.s32.totalorder %s780_s17, %s776_s16 }
   0x7   : > { %p170_p2 = scmp.eq.s32.totalorder %s593_s21, 1  ;;  %p175_p3 = scmp.ne.s32.totalorder %s776_s16, %s772_s15 }
   0x8   : > { %s982_s23 = smov (%p38_p0, %s36_s23), 0  ;;  %p176_p5 = scmp.eq.s32.totalorder %s594_s22, 1 }
   0x9   : > { %p863_p4 = por %p170_p2, %p169_p1  ;;  %s152_s26 = ssub.s32 %s788_s19, %s982_s23 }
   0xa   : > { %p597_p6 = scmp.ge.s32.totalorder %s792_s20, 1  ;;  %p157_p7 = scmp.eq.s32.totalorder %s152_s26, 0 }
   0xb   : > { %p870_p8 = por %p176_p5, %p175_p3  ;;  %p236_p9 = scmp.lt.s32.totalorder %s792_s20, 3 }
   0xc   : > { %s876_s28 = scalar_select %p157_p7, %s780_s17, %s159_s24  }
   0xd   : > { %p237_p10 = pnand %p597_p6, %p236_p9 }
   0xe   : > { %p286_p11 = scmp.lt.s32.totalorder (!%p237_p10), %s784_s18, 1  ;;  %v794_v0 = vmov (!%p237_p10), 0.0   ;;  %vm795_vm0 = vmmov (!%p237_p10), 0   ;;  %v796_v1 = vmov (!%p237_p10), 0   ;;  %vm381_vm1 = vcmask (!%p237_p10), 261120   ;;  %s283_s22 = sand.u32 (!%p237_p10), 1, %s776_s16  }
   0xf   : > { %240 = sbr.rel (%p237_p10) target bundleno = 321 (0x141), region = 36  ;;  %627 = vmatprep.subr.bf16.mxu0 (!%p237_p10), %v794_v0  ;;  %643 = vmatprep.mubr.msk.bf16.mxu0 (!%p237_p10), %vm795_vm0, %v794_v0  ;;  %s598_s24 = sshll.u32 (!%p237_p10), %s283_s22, 3 }
  0x10   : > { %705 = vset.pattern.permute.xlu0 (!%p237_p10), %v796_v1  ;;  %s614_s6 = sshll.u32 (!%p237_p10), %s784_s18, 7 }
  0x16   : > { %s880_s29 = scalar_select %p286_p11, %s784_s18, 1 }
  0x18   : > { %s617_s30 = sshll.u32 %s880_s29, 6  ;;  %s602_s8 = sshll.u32 %s880_s29, 3 }
  0x19   : > { %s886_s7 = scalar_lea.vmem %s970_s1, %s617_s30  ;;  %s315_s11 = scalar_lea.vmem %s972_s3, %s602_s8 }
  0x1a   : > { %v706_v2 = vld [vmem:[%s886_s7] sm:$0xff]   ;;  %v707_v4 = vld [vmem:[%s886_s7 + $0x8] sm:$0xff]   ;;  %v708_v7 = vld [vmem:[%s886_s7 + $0x10] sm:$0xff]   ;;  %s599_s12 = sshll.u32 %s880_s29, 2  ;;  %s308_s5 = scalar_lea.vmem %s971_s2, %s880_s29 }
  0x1b   : > { %v386_v3 = vsel %vm381_vm1, %v706_v2, 0  ;;  %v389_v5 = vsel %vm381_vm1, %v707_v4, 0  ;;  %v449_v6 = vld [vmem:[%s315_s11] sm:$0xff]  ;;  %v392_v8 = vsel %vm381_vm1, %v708_v7, 0  ;;  %v709_v9 = vld [vmem:[%s886_s7 + $0x18] sm:$0xff]   ;;  %v711_v13 = vld [vmem:[%s886_s7 + $0x28] sm:$0xff]   ;;  %s292_s21 = scalar_lea.vmem %s969_s0, %s599_s12  ;;  %s922_s11 = scalar_lea.hbm %s973_s4, %s614_s6 }
  0x1c   : > { %628 = vmatpush3.bf16.xpose.msra.mxu0 %v386_v3  ;;  %452 = vperm.xlu0 %705, %v449_v6   ;;  %v395_v10 = vsel %vm381_vm1, %v709_v9, 0  ;;  %v710_v11 = vld [vmem:[%s886_s7 + $0x20] sm:$0xff]   ;;  %v401_v14 = vsel %vm381_vm1, %v711_v13, 0  ;;  %v712_v15 = vld [vmem:[%s886_s7 + $0x30] sm:$0xff]   ;;  %v713_v17 = vld [vmem:[%s886_s7 + $0x38] sm:$0xff]   ;;  %s285_s7 = scalar_lea.vmem [#allocation2], %s598_s24 }
  0x1d   : > { %629 = vmatprep.subr.bf16.mxu0 %v794_v0  ;;  %v398_v12 = vsel %vm381_vm1, %v710_v11, 0  ;;  %v404_v16 = vsel %vm381_vm1, %v712_v15, 0  ;;  %v407_v18 = vsel %vm381_vm1, %v713_v17, 0  ;;  %v317_v19 = vld [vmem:[%s292_s21] sm:$0xf]  ;;  %s473_s8 = sshll.u32 %s285_s7, 4  ;;  %s924_s8 = int_to_ptr.vmem [resolvable:$true] %s473_s8 }
  0x1e   : > { %v603_v20 = vld [vmem:[%s308_s5] ss:$0 sm:$0xff]  ;;  %s458_s29 = scalar_lea.sflag [#allocation3], %s283_s22  ;;  %s714_s18 = scalar_lea.vmem %s924_s8, 128 }
  0x1f   : > { %p715_p12 = scmp.ne.s32.totalorder %s924_s8, %s714_s18  ;;  %s797_s12 = smov [#allocation2]  }
  0x20   : > { %s718_s13 = sshll.u32 %s797_s12, 4  ;;  %s719_s13 = int_to_ptr.vmem [resolvable:$false] %s718_s13 }
  0x21   : > { %p716_p13 = pnand %p715_p12, %p863_p4  ;;  %s720_s14 = scalar_lea.vmem %s719_s13, 256 }
  0x22   : > { %p721_p1 = scmp.lt.s32.totalorder %s924_s8, %s719_s13  ;;  %p722_p2 = scmp.lt.s32.totalorder %s720_s14, %s714_s18 }
  0x23   : > { %p717_p0 = pneg %p716_p13 }
  0x24   : > { %630 = vmatpush3.bf16.xpose.msra.mxu0 %v389_v5  ;;  %p723_p3 = por %p722_p2, %p721_p1 }
  0x25   : > { %631 = vmatprep.subr.bf16.mxu0 %v794_v0 }
  0x26   : > { %p724_p5 = pnand %p723_p3, %p717_p0 }
  0x2c   : > { %632 = vmatpush3.bf16.xpose.msra.mxu0 %v392_v8 }
  0x2d   : > { %633 = vmatprep.subr.bf16.mxu0 %v794_v0 }
  0x34   : > { %634 = vmatpush3.bf16.xpose.msra.mxu0 %v395_v10 }
  0x35   : > { %635 = vmatprep.subr.bf16.mxu0 %v794_v0 }
  0x3c   : > { %636 = vmatpush3.bf16.xpose.msra.mxu0 %v398_v12 }
  0x3d   : > { %637 = vmatprep.subr.bf16.mxu0 %v794_v0 }
  0x44   : > { %638 = vmatpush3.bf16.xpose.msra.mxu0 %v401_v14 }
  0x45   : > { %639 = vmatprep.subr.bf16.mxu0 %v794_v0 }
  0x4c   : > { %640 = vmatpush3.bf16.xpose.msra.mxu0 %v404_v16 }
  0x4d   : > { %641 = vmatprep.subr.bf16.mxu0 %v794_v0 }
  0x54   : > { %642 = vmatpush3.bf16.xpose.msra.mxu0 %v407_v18 }
  0x5b   : > { %644 = vmatmul.mubr.msk.bf16.vlgmr.msra.gmra.mrb[0].mxu0 %vm381_vm1, %v317_v19 }
  0x9b   : > { %v453_v22 = vpop.permute.xlu0 %452 }
 0x12e   : > { %v443_v21 = vpop.f32.mrb[0].mxu0 }
 0x12f   : > { %v444_v23 = vadd.f32 %v603_v20, %v443_v21  ;;  %v645_v24 = vpop.f32.mrb[1].mxu0 }
 0x130   : > { %v446_v25 = vpop.f32.mrb[2].mxu0 }
 0x131   : > { %v455_v26 = vadd.f32 %v453_v22, %v444_v23  ;;  %v646_v27 = vpop.f32.mrb[3].mxu0 }
 0x133   : > { %456 = vst [vmem:[%s285_s7] sm:$0xff] %v455_v26 }
 0x134   : > { %727 = shalt.err (!%p724_p5)
}
 0x135   : > { %s728_s21 = scalar_lea.hbm %s922_s11, 128  ;;  %s732_s26 = scalar_lea.hbm %s973_s4, 256 }
 0x136   : > { %p729_p6 = scmp.ne.s32.totalorder %s922_s11, %s728_s21  ;;  %p733_p10 = scmp.lt.u32.totalorder %s922_s11, %s973_s4 }
 0x137   : > { %p734_p11 = scmp.lt.u32.totalorder %s732_s26, %s728_s21  ;;  %p736_p13 = scmp.lt.u32.totalorder %s728_s21, %s922_s11 }
 0x138   : > { %p730_p7 = pnand %p729_p6, %p863_p4 }
 0x139   : > { %p735_p12 = por %p734_p11, %p733_p10 }
 0x13a   : > { %p731_p9 = pneg %p730_p7 }
 0x13b   : > { %p737_p0 = por %p736_p13, %p735_p12 }
 0x13d   : > { %p738_p1 = pnand %p737_p0, %p731_p9 }
 0x13f   : > { %741 = shalt.err (!%p738_p1)
}
 0x140   : > { %647 = dma.vmem_to_hbm [thread:$0]  (%p863_p4), %s924_s8, 128, %s922_s11, %s458_s29  }
 0x141 PF: > { %p653_p2 = scmp.ge.s32.totalorder %s792_s20, 2  ;;  %s485_s6 = sand.u32 1, %s772_s15  }
 0x142   : > { %s486_s7 = scalar_lea.sflag [#allocation3], %s485_s6 }
 0x143   : > { %p650_p3 = pnand %p653_p2, %p870_p8 }
 0x145   : > { %767 = dma.done.wait (!%p650_p3), %s486_s7, 128  }
 0x146   : > { %769 = vsyncadd (!%p650_p3), %s486_s7, 4294967168  ;;  %s17_s20 = sadd.s32 1, %s792_s20   ;;  %s976_s15 = smov %s776_s16 }
 0x147   : > { %p14_p5 = scmp.ge.s32.totalorder %s17_s20, 4   ;;  %s977_s16 = smov %s780_s17 }
 0x148   : > { %s978_s17 = smov %s876_s28  ;;  %s979_s18 = smov %s788_s19 }
 0x149   : > { %s980_s19 = smov %s982_s23  ;;  %16 = sbr.rel (!%p14_p5) target bundleno = 4 (0x4), region = 80 }
 0x150   :  { %491 = vsyncpa [#allocation3], 1 }
 0x151   :  { %493 = vsyncpa [#allocation3 + $0x1], 1 }

</bundles_post_ra>
